<compile_context>
chip_gen: v7x
topology: tpu7x:2x2x1
jax: 0.10.0
libtpu: 0.0.40
codegen_flags: <defaults>
</compile_context>

<pallas_src>
import functools

import jax
import jax.numpy as jnp
from jax.experimental import pallas as pl
from jax.experimental.pallas import tpu as pltpu


def _round_up(x: int, m: int) -> int:
    return ((x + m - 1) // m) * m


# -----------------------------------------------------------------------------
# Kernels
# -----------------------------------------------------------------------------

def _videoclip_single_block_kernel(x_ref, wenc_ref, wfc_ref, out_ref):
    """Small-problem fast path: one invocation, encode -> fc, no grid/scratch.

    x_ref   : (B_pad, CHW_pad)  bf16  frame-mean pixels
    wenc_ref: (CHW_pad, D_pad)  bf16  encode weight
    wfc_ref : (D_pad, NC_pad)   f32   fc weight
    out_ref : (B_pad, NC_pad)   f32   logits (bias added in wrapper)
    """
    feats = jnp.dot(x_ref[...], wenc_ref[...],
                    preferred_element_type=jnp.float32)          # (B_pad, D_pad)
    out_ref[...] = jnp.dot(feats, wfc_ref[...],
                           preferred_element_type=jnp.float32)   # (B_pad, NC_pad)


def _videoclip_tiled_kernel(x_ref, wenc_ref, wfc_ref, out_ref, acc_ref):
    """Streaming encode (K-tiled over CHW) + fc, with D split into column blocks.

    grid = (n_d, n_k): d = encode-output column block ("parallel"; shards the
    W_enc stream across TensorCores on v7x), k = CHW reduction ("arbitrary").

    x_ref   : (B_pad, tk)      bf16  frame-mean pixels, K-tile k
    wenc_ref: (tk, td)         bf16  encode weight tile (k, d)
    wfc_ref : (td, NC_pad)     f32   fc weight rows for this d block
    out_ref : (B_pad, NC_pad)  f32   partial logits for this d block
    acc_ref : (B_pad, td)      f32   VMEM encode accumulator
    """
    k = pl.program_id(1)

    @pl.when(k == 0)
    def _init():
        acc_ref[...] = jnp.zeros_like(acc_ref)

    # Dominant work: bf16 operands, f32 MXU accumulation (HBM-bound on W_enc).
    acc_ref[...] += jnp.dot(x_ref[...], wenc_ref[...],
                            preferred_element_type=jnp.float32)

    @pl.when(k == pl.num_programs(1) - 1)
    def _finalize():
        out_ref[...] = jnp.dot(acc_ref[...], wfc_ref[...],
                               preferred_element_type=jnp.float32)


# -----------------------------------------------------------------------------
# One-time parameter preparation (frozen model): pad + cast + bias fold.
# -----------------------------------------------------------------------------

def prepare_videoclip_params(w_enc, b_enc, w_fc, b_fc, *, tk=8192, td=256):
    """Pads/casts the frozen weights once so the per-call forward never does.

    w_enc: (CHW, D) affine encode_image stub weight; b_enc: (D,)
    w_fc : (D, NC)  classifier weight (transpose of torch nn.Linear.weight)
    b_fc : (NC,)
    tk   : CHW K-tile (multiple of 128). 8192 keeps the double-buffered W_enc
           tile at 8 MiB (td=256) — safe under v7x's 64 MiB VMEM; on
           v5e/v6e (128 MiB) it can be swept up to 16384.
    td   : encode-output column block (multiple of 128); 256 gives 2 blocks at
           real CLIP D=512 -> both v7x TensorCores stream W_enc concurrently.
    """
    CHW, D = w_enc.shape
    NC = w_fc.shape[1]

    D_pad = _round_up(D, 128)
    td = min(_round_up(td, 128), D_pad)
    D_pad = _round_up(D_pad, td)

    tk = max(128, _round_up(tk, 128))
    tk = min(tk, _round_up(CHW, 128))
    CHW_pad = _round_up(CHW, tk)
    NC_pad = _round_up(NC, 128)

    w_enc = w_enc.astype(jnp.float32)
    w_fc = w_fc.astype(jnp.float32)

    # Zero padding is exact: padded K rows/cols contribute 0, padded D/NC
    # columns are sliced away in the wrapper.
    wenc_p = jnp.pad(w_enc, ((0, CHW_pad - CHW), (0, D_pad - D))).astype(jnp.bfloat16)
    wfc_p = jnp.pad(w_fc, ((0, D_pad - D), (0, NC_pad - NC)))

    # Fold the (affine) encoder bias into the classifier bias:
    #   (x @ We + be) @ Wf + bf == x @ We @ Wf + (be @ Wf + bf)
    bias_fold = b_enc.astype(jnp.float32) @ w_fc + b_fc.astype(jnp.float32)  # (NC,)

    params = dict(wenc_p=wenc_p, wfc_p=wfc_p, bias_fold=bias_fold)
    config = dict(tk=tk, td=td, num_classes=NC)
    return params, config


# -----------------------------------------------------------------------------
# Forward
# -----------------------------------------------------------------------------

@functools.partial(jax.jit, static_argnames=("tk", "td", "num_classes"))
def videoclip_forward(frames, wenc_p, wfc_p, bias_fold, *, tk, td, num_classes):
    """frames: (B, F, C, H, W) float32 -> logits (B, num_classes) float32."""
    B, F, C, H, W = frames.shape
    CHW = C * H * W
    CHW_pad, D_pad = wenc_p.shape
    NC_pad = wfc_p.shape[1]
    B_pad = _round_up(B, 16)          # bf16 sublane-packing friendly row count
    n_k = CHW_pad // tk
    n_d = D_pad // td

    # Frame mean folded into the input before the encode matmul:
    # mean_f(x) @ W == mean_f(x @ W) for the affine stub -> F x less work/DMA.
    # TODO(synk): revert to per-frame encoding once a real nonlinear CLIP
    # encode_image replaces the affine stub (mean/bias folds become invalid).
    x_mean = frames.astype(jnp.float32).reshape(B, F, CHW).mean(axis=1)  # (B, CHW)
    x_p = jnp.pad(x_mean, ((0, B_pad - B), (0, CHW_pad - CHW))).astype(jnp.bfloat16)

    if n_k == 1 and n_d == 1:
        # Small-problem fast path: no reduction grid / accumulator overhead.
        out_p = pl.pallas_call(
            _videoclip_single_block_kernel,
            out_shape=jax.ShapeDtypeStruct((B_pad, NC_pad), jnp.float32),
            compiler_params=pltpu.CompilerParams(
                vmem_limit_bytes=48 * 1024 * 1024),
        )(x_p, wenc_p, wfc_p)
        partial_sum = out_p
    else:
        out_p = pl.pallas_call(
            _videoclip_tiled_kernel,
            out_shape=jax.ShapeDtypeStruct((n_d, B_pad, NC_pad), jnp.float32),
            grid_spec=pltpu.PrefetchScalarGridSpec(
                num_scalar_prefetch=0,
                grid=(n_d, n_k),
                in_specs=[
                    pl.BlockSpec((B_pad, tk), lambda d, k: (0, k)),     # x K-tiles
                    pl.BlockSpec((tk, td), lambda d, k: (k, d)),        # W_enc tiles
                    pl.BlockSpec((td, NC_pad), lambda d, k: (d, 0)),    # W_fc rows
                ],
                out_specs=pl.BlockSpec((None, B_pad, NC_pad),
                                       lambda d, k: (d, 0, 0)),
                scratch_shapes=[pltpu.VMEM((B_pad, td), jnp.float32)],
            ),
            compiler_params=pltpu.CompilerParams(
                # d axis is independent -> "parallel" (v7x megacore sharding);
                # k axis is the CHW reduction -> "arbitrary".
                dimension_semantics=("parallel", "arbitrary"),
                # Headroom below v7x's 64 MiB physical VMEM (fine on v5e/v6e).
                vmem_limit_bytes=48 * 1024 * 1024,
            ),
        )(x_p, wenc_p, wfc_p)
        # Tiny (n_d, B_pad, NC_pad) partial-logit sum; keeps the d axis
        # write-disjoint so it can be "parallel".
        partial_sum = out_p.sum(axis=0)

    return partial_sum[:B, :num_classes] + bias_fold


# -----------------------------------------------------------------------------
# Self-test
# -----------------------------------------------------------------------------

if __name__ == "__main__":
    # Small shapes consistent with the module's forward.
    B, F, C, H, W = 2, 8, 4, 16, 16          # batch, frames/video, NCHW
    D = 32                                    # clip_model.visual.output_dim
    NUM_CLASSES = 2
    CHW = C * H * W

    key = jax.random.PRNGKey(0)
    (k_frames, k_wenc, k_benc, k_wfc, k_bfc,
     k_wenc2, k_benc2, k_wfc2, k_bfc2) = jax.random.split(key, 9)

    frames = jax.random.normal(k_frames, (B, F, C, H, W), dtype=jnp.float32)

    # Deterministic synthetic encoder parameters (stand-in for frozen CLIP).
    w_enc = jax.random.normal(k_wenc, (CHW, D), jnp.float32) * 0.02
    b_enc = jax.random.normal(k_benc, (D,), jnp.float32) * 0.02
    # nn.Linear(output_dim, num_classes): torch weight is (NC, D); we store the
    # transpose (D, NC) so the forward does video @ w_fc + b_fc.
    w_fc = jax.random.normal(k_wfc, (D, NUM_CLASSES), jnp.float32) * 0.1
    b_fc = jax.random.normal(k_bfc, (NUM_CLASSES,), jnp.float32) * 0.1

    def reference(frames, w_enc, b_enc, w_fc, b_fc):
        # Pure-JAX f32 reference of the exact torch semantics:
        # per-frame encode -> mean over frames -> fc.
        Bv, Fv = frames.shape[:2]
        chw = frames.shape[2] * frames.shape[3] * frames.shape[4]
        x_flat = frames.reshape(Bv * Fv, chw)
        feats = x_flat @ w_enc + b_enc
        video = feats.reshape(Bv, Fv, -1).mean(axis=1)
        return video @ w_fc + b_fc

    logits_ref = reference(frames, w_enc, b_enc, w_fc, b_fc)

    # Path 1: default tiling -> whole problem fits one tile -> single-block path.
    params, cfg = prepare_videoclip_params(w_enc, b_enc, w_fc, b_fc)
    logits = jax.block_until_ready(
        videoclip_forward(frames, params["wenc_p"], params["wfc_p"],
                          params["bias_fold"], **cfg))
    assert logits.shape == (B, NUM_CLASSES)
    # Encode matmul runs with bf16 operands (f32 accumulation).
    assert jnp.allclose(logits, logits_ref, atol=2e-2, rtol=2e-2)

    # Path 2: forced small K-tile -> exercises the K-tiled reduction path.
    params_t, cfg_t = prepare_videoclip_params(w_enc, b_enc, w_fc, b_fc,
                                               tk=256, td=128)
    logits_t = jax.block_until_ready(
        videoclip_forward(frames, params_t["wenc_p"], params_t["wfc_p"],
                          params_t["bias_fold"], **cfg_t))
    assert jnp.allclose(logits_t, logits_ref, atol=2e-2, rtol=2e-2)

    # Path 3: wider feature dim -> exercises the D-column "parallel" split
    # (n_d > 1, partial-logit sum), i.e. the v7x megacore production path.
    D2 = 256
    w_enc2 = jax.random.normal(k_wenc2, (CHW, D2), jnp.float32) * 0.02
    b_enc2 = jax.random.normal(k_benc2, (D2,), jnp.float32) * 0.02
    w_fc2 = jax.random.normal(k_wfc2, (D2, NUM_CLASSES), jnp.float32) * 0.1
    b_fc2 = jax.random.normal(k_bfc2, (NUM_CLASSES,), jnp.float32) * 0.1
    params2, cfg2 = prepare_videoclip_params(w_enc2, b_enc2, w_fc2, b_fc2,
                                             tk=256, td=128)
    logits2 = jax.block_until_ready(
        videoclip_forward(frames, params2["wenc_p"], params2["wfc_p"],
                          params2["bias_fold"], **cfg2))
    logits2_ref = reference(frames, w_enc2, b_enc2, w_fc2, b_fc2)
    assert jnp.allclose(logits2, logits2_ref, atol=3e-2, rtol=3e-2)

    print("KERNEL_OK")
</pallas_src>

<mosaic_0001>
module attributes {stable_mosaic.version = 11 : i64} {
  func.func @_videoclip_single_block_kernel(%arg0: memref<16x1024xbf16, #tpu.memory_space<vmem>>, %arg1: memref<1024x128xbf16, #tpu.memory_space<vmem>>, %arg2: memref<128x128xf32, #tpu.memory_space<vmem>>, %arg3: memref<16x128xf32, #tpu.memory_space<vmem>>) attributes {dimension_semantics = [], scalar_prefetch = 0 : i64, scratch_operands = 0 : i64, tpu.core_type = #tpu.core_type<tc>} {
    %c0 = arith.constant 0 : index
    %c0_0 = arith.constant 0 : index
    %0 = vector.load %arg0[%c0, %c0_0] : memref<16x1024xbf16, #tpu.memory_space<vmem>>, vector<16x1024xbf16>
    %c0_1 = arith.constant 0 : index
    %c0_2 = arith.constant 0 : index
    %1 = vector.load %arg1[%c0_1, %c0_2] : memref<1024x128xbf16, #tpu.memory_space<vmem>>, vector<1024x128xbf16>
    %cst = arith.constant dense<0.000000e+00> : vector<16x128xf32>
    %2 = tpu.matmul %0, %1, %cst {dimension_numbers = #tpu.dot_dimension_numbers<[1], [0], [0], [1], [0, 0, 1, 1], [], []>} : vector<16x1024xbf16>, vector<1024x128xbf16>, vector<16x128xf32> -> vector<16x128xf32>
    %c0_3 = arith.constant 0 : index
    %c0_4 = arith.constant 0 : index
    %3 = vector.load %arg2[%c0_3, %c0_4] : memref<128x128xf32, #tpu.memory_space<vmem>>, vector<128x128xf32>
    %cst_5 = arith.constant dense<0.000000e+00> : vector<16x128xf32>
    %4 = tpu.matmul %2, %3, %cst_5 {dimension_numbers = #tpu.dot_dimension_numbers<[1], [0], [0], [1], [0, 0, 1, 1], [], []>} : vector<16x128xf32>, vector<128x128xf32>, vector<16x128xf32> -> vector<16x128xf32>
    %c0_6 = arith.constant 0 : index
    %c0_7 = arith.constant 0 : index
    %5 = vector.load %arg3[%c0_6, %c0_7] : memref<16x128xf32, #tpu.memory_space<vmem>>, vector<16x128xf32>
    tpu.vector_store %arg3[%c0_6, %c0_7], %4 {strides = array<i32>} : memref<16x128xf32, #tpu.memory_space<vmem>>, vector<16x128xf32>,
    return
  }
}

</mosaic_0001>

<bundles_post_ra>
// kernel: videoclip_forward.1
= control target key start
LH: loop header
LB: loop body
LE: loop exit
PB: predicated region body
PF: predicated region fallthrough
CT: control target
= control target key end

     0   :  { %s1435_s1 = inlined_call_operand.vmem [shape: bf16[1024,128], index: 1, kind: input, shape index: {}]   ;;  %s1436_s0 = inlined_call_operand.vmem [shape: bf16[16,1024], index: 0, kind: input, shape index: {}]   ;;  %s1437_s2 = inlined_call_operand.vmem [shape: f32[128,128], index: 2, kind: input, shape index: {}]   ;;  %s1438_s3 = inlined_call_operand.vmem [shape: f32[16,128], index: 3, kind: output, shape index: {}]  }
   0x1   :  { %v1081_v0 = vld [vmem:[%s1435_s1 + $0x40] sm:$0xff]   ;;  %v1085_v4 = vld [vmem:[%s1435_s1 + $0x48] sm:$0xff]   ;;  %v1089_v8 = vld [vmem:[%s1435_s1 + $0x50] sm:$0xff]  }
   0x2   :  { %v1082_v1 = vld [vmem:[%s1435_s1 + $0xc0] sm:$0xff]   ;;  %908 = vmatprep.subr.bf16.mxu0 %v1081_v0  ;;  %v1086_v5 = vld [vmem:[%s1435_s1 + $0xc8] sm:$0xff]   ;;  %v1090_v9 = vld [vmem:[%s1435_s1 + $0xd0] sm:$0xff]  }
   0x3   :  { %v1083_v2 = vld [vmem:[%s1435_s1] sm:$0xff]   ;;  %930 = vmatprep.subr.bf16.mxu1 %v1082_v1  ;;  %v1087_v6 = vld [vmem:[%s1435_s1 + $0x8] sm:$0xff]   ;;  %v1091_v10 = vld [vmem:[%s1435_s1 + $0x10] sm:$0xff]  }
   0x4   :  { %v1084_v3 = vld [vmem:[%s1435_s1 + $0x80] sm:$0xff]   ;;  %909 = vmatpush3.bf16.msra.mxu0 %v1083_v2  ;;  %v1088_v7 = vld [vmem:[%s1435_s1 + $0x88] sm:$0xff]   ;;  %v1092_v11 = vld [vmem:[%s1435_s1 + $0x90] sm:$0xff]  }
   0x5   :  { %931 = vmatpush3.bf16.msra.mxu1 %v1084_v3  ;;  %910 = vmatprep.subr.bf16.mxu0 %v1085_v4  ;;  %v1093_v12 = vld [vmem:[%s1435_s1 + $0x58] sm:$0xff]   ;;  %v1097_v16 = vld [vmem:[%s1435_s1 + $0x60] sm:$0xff]   ;;  %v1101_v20 = vld [vmem:[%s1435_s1 + $0x68] sm:$0xff]  }
   0x6   :  { %932 = vmatprep.subr.bf16.mxu1 %v1086_v5  ;;  %v1094_v13 = vld [vmem:[%s1435_s1 + $0xd8] sm:$0xff]   ;;  %v1098_v17 = vld [vmem:[%s1435_s1 + $0xe0] sm:$0xff]   ;;  %v1102_v21 = vld [vmem:[%s1435_s1 + $0xe8] sm:$0xff]  }
   0x7   :  { %v1095_v14 = vld [vmem:[%s1435_s1 + $0x18] sm:$0xff]   ;;  %v1099_v18 = vld [vmem:[%s1435_s1 + $0x20] sm:$0xff]   ;;  %v1103_v22 = vld [vmem:[%s1435_s1 + $0x28] sm:$0xff]  }
   0x8   :  { %911 = vmatpush3.bf16.msra.mxu0 %v1087_v6  ;;  %v1096_v15 = vld [vmem:[%s1435_s1 + $0x98] sm:$0xff]   ;;  %v1100_v19 = vld [vmem:[%s1435_s1 + $0xa0] sm:$0xff]   ;;  %v1104_v23 = vld [vmem:[%s1435_s1 + $0xa8] sm:$0xff]  }
   0x9   :  { %933 = vmatpush3.bf16.msra.mxu1 %v1088_v7  ;;  %912 = vmatprep.subr.bf16.mxu0 %v1089_v8  ;;  %v1105_v24 = vld [vmem:[%s1435_s1 + $0x70] sm:$0xff]   ;;  %v1109_v28 = vld [vmem:[%s1435_s1 + $0x78] sm:$0xff]   ;;  %v15_v32 = vld [vmem:[%s1436_s0] sm:$0xff] }
   0xa   :  { %934 = vmatprep.subr.bf16.mxu1 %v1090_v9  ;;  %v1106_v25 = vld [vmem:[%s1435_s1 + $0xf0] sm:$0xff]   ;;  %v1110_v29 = vld [vmem:[%s1435_s1 + $0xf8] sm:$0xff]   ;;  %v19_v33 = vld [vmem:[%s1436_s0 + $0x20] sm:$0xff] }
   0xb   :  { %v1107_v26 = vld [vmem:[%s1435_s1 + $0x30] sm:$0xff]   ;;  %v1111_v30 = vld [vmem:[%s1435_s1 + $0x38] sm:$0xff]   ;;  %v16_v34 = vld [vmem:[%s1436_s0 + $0x8] sm:$0xff]  ;;  %v836_v35 = vcombine.low %v15_v32, %v19_v33  ;;  %v837_v36 = vcombine.high %v15_v32, %v19_v33 }
   0xc   :  { %913 = vmatpush3.bf16.msra.mxu0 %v1091_v10  ;;  %v1108_v27 = vld [vmem:[%s1435_s1 + $0xb0] sm:$0xff]   ;;  %v1112_v31 = vld [vmem:[%s1435_s1 + $0xb8] sm:$0xff]   ;;  %v20_v37 = vld [vmem:[%s1436_s0 + $0x28] sm:$0xff] }
   0xd   :  { %935 = vmatpush3.bf16.msra.mxu1 %v1092_v11  ;;  %914 = vmatprep.subr.bf16.mxu0 %v1093_v12  ;;  %v838_v38 = vcombine.low %v16_v34, %v20_v37  ;;  %v839_v39 = vcombine.high %v16_v34, %v20_v37  ;;  %v1113_v40 = vld [vmem:[%s1435_s1 + $0x140] sm:$0xff]   ;;  %v1117_v44 = vld [vmem:[%s1435_s1 + $0x148] sm:$0xff]   ;;  %v1121_v48 = vld [vmem:[%s1435_s1 + $0x150] sm:$0xff]  }
   0xe   :  { %936 = vmatprep.subr.bf16.mxu1 %v1094_v13  ;;  %607 = vmatprep.mubr.bf16.mxu0 %v837_v36  ;;  %v1114_v41 = vld [vmem:[%s1435_s1 + $0x1c0] sm:$0xff]   ;;  %v1118_v45 = vld [vmem:[%s1435_s1 + $0x1c8] sm:$0xff]   ;;  %v1122_v49 = vld [vmem:[%s1435_s1 + $0x1d0] sm:$0xff]  }
   0xf   :  { %648 = vmatprep.mubr.bf16.mxu1 %v839_v39  ;;  %v1115_v42 = vld [vmem:[%s1435_s1 + $0x100] sm:$0xff]   ;;  %v1119_v46 = vld [vmem:[%s1435_s1 + $0x108] sm:$0xff]   ;;  %v1123_v50 = vld [vmem:[%s1435_s1 + $0x110] sm:$0xff]  }
  0x10   :  { %915 = vmatpush3.bf16.msra.mxu0 %v1095_v14  ;;  %v1116_v43 = vld [vmem:[%s1435_s1 + $0x180] sm:$0xff]   ;;  %v1120_v47 = vld [vmem:[%s1435_s1 + $0x188] sm:$0xff]   ;;  %v1124_v51 = vld [vmem:[%s1435_s1 + $0x190] sm:$0xff]  }
  0x11   :  { %937 = vmatpush3.bf16.msra.mxu1 %v1096_v15  ;;  %916 = vmatprep.subr.bf16.mxu0 %v1097_v16  ;;  %v1125_v52 = vld [vmem:[%s1435_s1 + $0x158] sm:$0xff]   ;;  %v1129_v56 = vld [vmem:[%s1435_s1 + $0x160] sm:$0xff]   ;;  %v1133_v60 = vld [vmem:[%s1435_s1 + $0x168] sm:$0xff]  }
  0x12   :  { %938 = vmatprep.subr.bf16.mxu1 %v1098_v17  ;;  %v1126_v53 = vld [vmem:[%s1435_s1 + $0x1d8] sm:$0xff]   ;;  %v1130_v57 = vld [vmem:[%s1435_s1 + $0x1e0] sm:$0xff]   ;;  %v1134_v61 = vld [vmem:[%s1435_s1 + $0x1e8] sm:$0xff]  }
  0x13   :  { %v1127_v54 = vld [vmem:[%s1435_s1 + $0x118] sm:$0xff]   ;;  %v1131_v58 = vld [vmem:[%s1435_s1 + $0x120] sm:$0xff]   ;;  %v1135_v62 = vld [vmem:[%s1435_s1 + $0x128] sm:$0xff]  }
  0x14   :  { %917 = vmatpush3.bf16.msra.mxu0 %v1099_v18  ;;  %v1128_v55 = vld [vmem:[%s1435_s1 + $0x198] sm:$0xff]   ;;  %v1132_v59 = vld [vmem:[%s1435_s1 + $0x1a0] sm:$0xff]   ;;  %v1136_v63 = vld [vmem:[%s1435_s1 + $0x1a8] sm:$0xff]  }
  0x15   :  { %939 = vmatpush3.bf16.msra.mxu1 %v1100_v19  ;;  %918 = vmatprep.subr.bf16.mxu0 %v1101_v20  ;;  %v1137_v0 = vld [vmem:[%s1435_s1 + $0x170] sm:$0xff]   ;;  %v1141_v4 = vld [vmem:[%s1435_s1 + $0x178] sm:$0xff]   ;;  %v739_v16 = vld [vmem:[%s1437_s2] sm:$0xff] }
  0x16   :  { %940 = vmatprep.subr.bf16.mxu1 %v1102_v21  ;;  %v1138_v1 = vld [vmem:[%s1435_s1 + $0x1f0] sm:$0xff]   ;;  %v1142_v5 = vld [vmem:[%s1435_s1 + $0x1f8] sm:$0xff]   ;;  %v740_v17 = vld [vmem:[%s1437_s2 + $0x8] sm:$0xff] }
  0x17   :  { %v1139_v2 = vld [vmem:[%s1435_s1 + $0x130] sm:$0xff]   ;;  %v1143_v6 = vld [vmem:[%s1435_s1 + $0x138] sm:$0xff]   ;;  %v1049_v19 = vpack.c.bf16 %v740_v17, %v739_v16  ;;  %v751_v34 = vld [vmem:[%s1437_s2 + $0x60] sm:$0xff] }
  0x18   :  { %919 = vmatpush3.bf16.msra.mxu0 %v1103_v22  ;;  %v1140_v3 = vld [vmem:[%s1435_s1 + $0x1b0] sm:$0xff]   ;;  %v1144_v7 = vld [vmem:[%s1435_s1 + $0x1b8] sm:$0xff]   ;;  %v743_v22 = vld [vmem:[%s1437_s2 + $0x20] sm:$0xff] }
  0x19   :  { %941 = vmatpush3.bf16.msra.mxu1 %v1104_v23  ;;  %920 = vmatprep.subr.bf16.mxu0 %v1105_v24  ;;  %v17_v8 = vld [vmem:[%s1436_s0 + $0x10] sm:$0xff]  ;;  %v18_v12 = vld [vmem:[%s1436_s0 + $0x18] sm:$0xff]  ;;  %v744_v23 = vld [vmem:[%s1437_s2 + $0x28] sm:$0xff] }
  0x1a   :  { %942 = vmatprep.subr.bf16.mxu1 %v1106_v25  ;;  %v21_v9 = vld [vmem:[%s1436_s0 + $0x30] sm:$0xff]  ;;  %v22_v13 = vld [vmem:[%s1436_s0 + $0x38] sm:$0xff]  ;;  %v1057_v24 = vpack.c.bf16 %v744_v23, %v743_v22 }
  0x1b   :  { %v840_v10 = vcombine.low %v17_v8, %v21_v9  ;;  %v841_v11 = vcombine.high %v17_v8, %v21_v9  ;;  %v842_v14 = vcombine.low %v18_v12, %v22_v13  ;;  %v843_v15 = vcombine.high %v18_v12, %v22_v13  ;;  %v741_v18 = vld [vmem:[%s1437_s2 + $0x10] sm:$0xff]  ;;  %v742_v20 = vld [vmem:[%s1437_s2 + $0x18] sm:$0xff] }
  0x1c   :  { %921 = vmatpush3.bf16.msra.mxu0 %v1107_v26  ;;  %v1053_v21 = vpack.c.bf16 %v742_v20, %v741_v18  ;;  %v745_v25 = vld [vmem:[%s1437_s2 + $0x30] sm:$0xff]  ;;  %v746_v26 = vld [vmem:[%s1437_s2 + $0x38] sm:$0xff] }
  0x1d   :  { %943 = vmatpush3.bf16.msra.mxu1 %v1108_v27  ;;  %922 = vmatprep.subr.bf16.mxu0 %v1109_v28  ;;  %v1061_v27 = vpack.c.bf16 %v746_v26, %v745_v25  ;;  %v747_v28 = vld [vmem:[%s1437_s2 + $0x40] sm:$0xff]  ;;  %v750_v32 = vld [vmem:[%s1437_s2 + $0x58] sm:$0xff]  ;;  %v753_v37 = vld [vmem:[%s1437_s2 + $0x70] sm:$0xff] }
  0x1e   :  { %944 = vmatprep.subr.bf16.mxu1 %v1110_v29  ;;  %v748_v29 = vld [vmem:[%s1437_s2 + $0x48] sm:$0xff] }
  0x20   :  { %923 = vmatpush3.bf16.msra.mxu0 %v1111_v30  ;;  %v1065_v30 = vpack.c.bf16 %v748_v29, %v747_v28 }
  0x21   :  { %945 = vmatpush3.bf16.msra.mxu1 %v1112_v31  ;;  %952 = vmatprep.subr.bf16.mxu0 %v1113_v40  ;;  %v749_v31 = vld [vmem:[%s1437_s2 + $0x50] sm:$0xff] }
  0x22   :  { %974 = vmatprep.subr.bf16.mxu1 %v1114_v41  ;;  %v1069_v33 = vpack.c.bf16 %v750_v32, %v749_v31 }
  0x23   :  { %608 = vmatmul.mubr.bf16.vlgmr.msra.gmra.mrb[0].mxu0 %v836_v35  ;;  %v752_v35 = vld [vmem:[%s1437_s2 + $0x68] sm:$0xff] }
  0x24   :  { %649 = vmatmul.mubr.bf16.vlgmr.msra.gmra.mrb[0].mxu1 %v838_v38  ;;  %953 = vmatpush3.bf16.msra.mxu0 %v1115_v42  ;;  %v1073_v36 = vpack.c.bf16 %v752_v35, %v751_v34  ;;  %v754_v38 = vld [vmem:[%s1437_s2 + $0x78] sm:$0xff] }
  0x25   :  { %975 = vmatpush3.bf16.msra.mxu1 %v1116_v43  ;;  %954 = vmatprep.subr.bf16.mxu0 %v1117_v44  ;;  %v1077_v39 = vpack.c.bf16 %v754_v38, %v753_v37 }
  0x26   :  { %976 = vmatprep.subr.bf16.mxu1 %v1118_v45  ;;  %689 = vmatprep.mubr.bf16.mxu0 %v841_v11 }
  0x27   :  { %730 = vmatprep.mubr.bf16.mxu1 %v843_v15 }
  0x28   :  { %955 = vmatpush3.bf16.msra.mxu0 %v1119_v46 }
  0x29   :  { %977 = vmatpush3.bf16.msra.mxu1 %v1120_v47  ;;  %956 = vmatprep.subr.bf16.mxu0 %v1121_v48 }
  0x2a   :  { %978 = vmatprep.subr.bf16.mxu1 %v1122_v49 }
  0x2c   :  { %957 = vmatpush3.bf16.msra.mxu0 %v1123_v50 }
  0x2d   :  { %979 = vmatpush3.bf16.msra.mxu1 %v1124_v51  ;;  %958 = vmatprep.subr.bf16.mxu0 %v1125_v52 }
  0x2e   :  { %980 = vmatprep.subr.bf16.mxu1 %v1126_v53 }
  0x30   :  { %959 = vmatpush3.bf16.msra.mxu0 %v1127_v54 }
  0x31   :  { %981 = vmatpush3.bf16.msra.mxu1 %v1128_v55  ;;  %960 = vmatprep.subr.bf16.mxu0 %v1129_v56 }
  0x32   :  { %982 = vmatprep.subr.bf16.mxu1 %v1130_v57 }
  0x34   :  { %961 = vmatpush3.bf16.msra.mxu0 %v1131_v58 }
  0x35   :  { %983 = vmatpush3.bf16.msra.mxu1 %v1132_v59  ;;  %962 = vmatprep.subr.bf16.mxu0 %v1133_v60 }
  0x36   :  { %984 = vmatprep.subr.bf16.mxu1 %v1134_v61 }
  0x38   :  { %963 = vmatpush3.bf16.msra.mxu0 %v1135_v62 }
  0x39   :  { %985 = vmatpush3.bf16.msra.mxu1 %v1136_v63  ;;  %964 = vmatprep.subr.bf16.mxu0 %v1137_v0 }
  0x3a   :  { %986 = vmatprep.subr.bf16.mxu1 %v1138_v1 }
  0x3c   :  { %965 = vmatpush3.bf16.msra.mxu0 %v1139_v2 }
  0x3d   :  { %987 = vmatpush3.bf16.msra.mxu1 %v1140_v3  ;;  %966 = vmatprep.subr.bf16.mxu0 %v1141_v4 }
  0x3e   :  { %988 = vmatprep.subr.bf16.mxu1 %v1142_v5 }
  0x40   :  { %967 = vmatpush3.bf16.msra.mxu0 %v1143_v6 }
  0x41   :  { %989 = vmatpush3.bf16.msra.mxu1 %v1144_v7  ;;  %1050 = vmatprep.subr.bf16.mxu0 %v1049_v19 }
  0x43   :  { %690 = vmatmul.mubr.bf16.vlgmr.msra.gmra.mrb[4].mxu0 %v840_v10 }
  0x44   :  { %731 = vmatmul.mubr.bf16.vlgmr.msra.gmra.mrb[4].mxu1 %v842_v14  ;;  %1052 = vmatpush3.bf16.msra.mxu0 %v1049_v19 }
  0x45   :  { %1054 = vmatprep.subr.bf16.mxu0 %v1053_v21 }
  0x48   :  { %1056 = vmatpush3.bf16.msra.mxu0 %v1053_v21 }
  0x49   :  { %1058 = vmatprep.subr.bf16.mxu0 %v1057_v24 }
  0x4c   :  { %1060 = vmatpush3.bf16.msra.mxu0 %v1057_v24 }
  0x4d   :  { %1062 = vmatprep.subr.bf16.mxu0 %v1061_v27 }
  0x50   :  { %1064 = vmatpush3.bf16.msra.mxu0 %v1061_v27 }
  0x51   :  { %1066 = vmatprep.subr.bf16.mxu0 %v1065_v30 }
  0x54   :  { %1068 = vmatpush3.bf16.msra.mxu0 %v1065_v30 }
  0x55   :  { %1070 = vmatprep.subr.bf16.mxu0 %v1069_v33 }
  0x58   :  { %1072 = vmatpush3.bf16.msra.mxu0 %v1069_v33 }
  0x59   :  { %1074 = vmatprep.subr.bf16.mxu0 %v1073_v36 }
  0x5c   :  { %1076 = vmatpush3.bf16.msra.mxu0 %v1073_v36 }
  0x5d   :  { %1078 = vmatprep.subr.bf16.mxu0 %v1077_v39 }
  0x60   :  { %1080 = vmatpush3.bf16.msra.mxu0 %v1077_v39 }
  0xf6   :  { %v924_v40 = vpop.f32.mrb[0].mxu0 }
  0xf7   :  { %v946_v41 = vpop.f32.mrb[0].mxu1  ;;  %v925_v42 = vpop.f32.mrb[1].mxu0 }
  0xf8   :  { %v926_v43 = vadd.f32 %v925_v42, %v924_v40  ;;  %v947_v44 = vpop.f32.mrb[1].mxu1  ;;  %v927_v45 = vpop.f32.mrb[2].mxu0 }
  0xf9   :  { %v948_v46 = vadd.f32 %v947_v44, %v946_v41  ;;  %v949_v47 = vpop.f32.mrb[2].mxu1  ;;  %v928_v48 = vpop.f32.mrb[3].mxu0 }
  0xfa   :  { %v929_v49 = vadd.f32 %v928_v48, %v927_v45  ;;  %v950_v50 = vpop.f32.mrb[3].mxu1 }
  0xfb   :  { %v651_v51 = vadd.f32 %v948_v46, %v926_v43  ;;  %v951_v52 = vadd.f32 %v950_v50, %v949_v47 }
  0xfd   :  { %v654_v53 = vadd.f32 %v951_v52, %v929_v49 }
 0x116   :  { %v968_v54 = vpop.f32.mrb[4].mxu0 }
 0x117   :  { %v990_v55 = vpop.f32.mrb[4].mxu1  ;;  %v969_v56 = vpop.f32.mrb[5].mxu0 }
 0x118   :  { %v970_v57 = vadd.f32 %v969_v56, %v968_v54  ;;  %v991_v58 = vpop.f32.mrb[5].mxu1  ;;  %v971_v59 = vpop.f32.mrb[6].mxu0 }
 0x119   :  { %v992_v60 = vadd.f32 %v991_v58, %v990_v55  ;;  %v993_v61 = vpop.f32.mrb[6].mxu1  ;;  %v972_v62 = vpop.f32.mrb[7].mxu0 }
 0x11a   :  { %v692_v63 = vadd.f32 %v970_v57, %v651_v51  ;;  %v973_v0 = vadd.f32 %v972_v62, %v971_v59  ;;  %v994_v1 = vpop.f32.mrb[7].mxu1 }
 0x11b   :  { %v995_v2 = vadd.f32 %v994_v1, %v993_v61 }
 0x11c   :  { %v733_v3 = vadd.f32 %v992_v60, %v692_v63  ;;  %v695_v4 = vadd.f32 %v973_v0, %v654_v53 }
 0x11e   :  { %v736_v5 = vadd.f32 %v995_v2, %v695_v4  ;;  %1046 = vmatprep.mubr.f32.mxu0 %v733_v3 }
 0x120   :  { %1047 = vmatmul.mubr.f32.vlgmr.msra.gmra.mrb[8].mxu0 %v736_v5 }
 0x1f3   :  { %v1048_v6 = vpop.f32.mrb[8].mxu0 }
 0x1f4   :  { %831 = vst [vmem:[%s1438_s3 + $0x8] sm:$0xff] %v1048_v6  ;;  %v821_v7 = vpop.f32.mrb[9].mxu0 }
 0x1f5   :  { %830 = vst [vmem:[%s1438_s3] sm:$0xff] %v821_v7 }

</bundles_post_ra>
